<compile_context>
chip_gen: v7x
topology: tpu7x:2x2x1
jax: 0.10.0
libtpu: 0.0.40
codegen_flags: <defaults>
</compile_context>

<pallas_src>
import math

import jax
import jax.numpy as jnp
from jax import lax
from jax.experimental import pallas as pl
from jax.experimental.pallas import tpu as pltpu


def _softplus(x):
    # Numerically stable softplus, matches F.softplus(beta=1).
    return jnp.maximum(x, 0.0) + jnp.log1p(jnp.exp(-jnp.abs(x)))


def _le_head_kernel(feat_ref, w1_ref, b1_ref, w2_ref, b2_ref, w3_ref, b3_ref,
                    z_ref, gw_ref):
    x = feat_ref[...]                                  # (bm, C, H), native dtype
    bm, C, H = x.shape
    F2 = z_ref.shape[-1]                               # 2 * feat_dim (lane-dense)
    F = F2 // 2

    # ---- proj MLP: Linear(H,H) -> ReLU -> one lane-dense Linear(H, 2F) ----
    x2 = x.reshape(bm * C, H)                          # view when C % sublane == 0
    h1 = jnp.dot(x2, w1_ref[...], preferred_element_type=jnp.float32)
    h1 = jnp.maximum(h1 + b1_ref[...].astype(jnp.float32), 0.0)
    z = jnp.dot(h1.astype(w2_ref.dtype), w2_ref[...],
                preferred_element_type=jnp.float32)
    z = z + b2_ref[...].astype(jnp.float32)
    lane = lax.broadcasted_iota(jnp.int32, z.shape, dimension=1)
    z = jnp.where(lane >= F, _softplus(z), z)          # softplus only on std half
    z_ref[...] = z.reshape(bm, C, F2).astype(z_ref.dtype)

    # ---- fused GroupWiseLinear heads (fc, alpha, beta): one reduce + store ----
    xf = x.astype(jnp.float32)                         # (bm, C, H)
    w3 = w3_ref[...].astype(jnp.float32)               # (3, C, H)
    gw = jnp.sum(xf[:, None, :, :] * w3[None, :, :, :], axis=-1)    # (bm, 3, C)
    gw = gw + b3_ref[...].astype(jnp.float32)[None, :, :]
    head = lax.broadcasted_iota(jnp.int32, gw.shape, dimension=1)
    gw = jnp.where(head >= 1, _softplus(gw) + 1e-6, gw)  # heads 1,2 = alpha,beta
    gw_ref[...] = gw.astype(gw_ref.dtype)


def _vmem_limit_bytes():
    """Generation-aware scoped-VMEM limit: ~64 MiB on v5e/v6e (128 MiB phys),
    ~41 MiB on v7x (64 MiB phys)."""
    try:
        cap = int(pltpu.get_tpu_info().vmem_capacity_bytes)
    except Exception:
        cap = 64 << 20
    return min(64 << 20, max(32 << 20, int(cap * 0.65)))


def _pick_block_rows(B, C, H, F, itemsize, vmem_limit):
    """Largest batch tile that fits the VMEM budget (incl. f32 intermediates),
    capped at ceil(B/2) so the parallel grid axis has >=2 steps, and nudged so
    bm*C fills the MXU M dimension when possible."""
    budget = int(vmem_limit * 0.7)
    # Bytes that scale with bm: streamed input/output blocks (double-buffered)
    # plus the in-kernel f32 intermediates (h1, z, group-wise broadcast, xf).
    per_row = (2 * C * H * itemsize
               + 2 * (C * 2 * F + 3 * C) * itemsize
               + (C * H + C * 2 * F + 3 * C * H + C * H) * 4)
    fixed = 2 * (H * H + 2 * H * F + 3 * C * H + H + 2 * F + 3 * C) * itemsize
    max_rows = max(1, (budget - fixed) // per_row)
    cap = B if B < 2 else -(-B // 2)          # ceil(B/2): >=2 grid steps (megacore)
    bm = int(min(max_rows, cap))
    # Prefer bm*C a multiple of 128 (>=256) so the reshaped matmul M dim fills
    # the MXU and the reshape stays a zero-cost view.
    step = 128 // math.gcd(C, 128)
    aligned = (bm // step) * step
    if aligned >= step and aligned * C >= 256:
        bm = aligned
    return max(1, bm)


def le_model_smile_head(features, params, *, feat_dim):
    """features: (B, num_class, hidden_dim) = encoder output hs[-1].
    Returns (out, z_mu, z_std, alpha, beta). The Beta sample `d` is drawn in
    the caller with jax.random."""
    B, C, H = features.shape
    F = feat_dim
    dtype = features.dtype

    # Keep matmul operands in the caller's dtype (bf16 goes straight to MXU).
    w1 = params["w1"].astype(dtype)
    b1 = params["b1"].astype(dtype).reshape(1, H)
    w2 = params["w2"].astype(dtype)                       # (H, 2F) whole -> lane-dense z
    b2 = params["b2"].astype(dtype).reshape(1, 2 * F)
    w3 = jnp.stack([params["wfc"], params["wa"], params["wb"]]).astype(dtype)  # (3,C,H)
    b3 = jnp.stack([params["bfc"], params["ba"], params["bb"]]).astype(dtype)  # (3,C)

    itemsize = jnp.dtype(dtype).itemsize
    vmem_limit = _vmem_limit_bytes()
    bm = _pick_block_rows(B, C, H, F, itemsize, vmem_limit)
    grid = (pl.cdiv(B, bm),)

    in_specs = [
        # Streamed per-grid-step block. (If profiling ever shows exposed DMA
        # waits, add pipeline_mode=pl.Buffered(3) here only.)
        pl.BlockSpec((bm, C, H), lambda i: (i, 0, 0)),    # features
        pl.BlockSpec((H, H), lambda i: (0, 0)),           # proj[0] weight
        pl.BlockSpec((1, H), lambda i: (0, 0)),           # proj[0] bias
        pl.BlockSpec((H, 2 * F), lambda i: (0, 0)),       # proj[2] weight (whole)
        pl.BlockSpec((1, 2 * F), lambda i: (0, 0)),       # proj[2] bias
        pl.BlockSpec((3, C, H), lambda i: (0, 0, 0)),     # stacked fc/alpha/beta W
        pl.BlockSpec((3, C), lambda i: (0, 0)),           # stacked fc/alpha/beta b
    ]
    out_specs = [
        pl.BlockSpec((bm, C, 2 * F), lambda i: (i, 0, 0)),  # z = [mu | softplus(std)]
        pl.BlockSpec((bm, 3, C), lambda i: (i, 0, 0)),      # stacked out/alpha/beta
    ]
    out_shape = (
        jax.ShapeDtypeStruct((B, C, 2 * F), dtype),
        jax.ShapeDtypeStruct((B, 3, C), dtype),
    )

    flops = 2 * B * C * H * (H + 2 * F) + 2 * 3 * B * C * H + 8 * B * C * (2 * F + 3)
    transcendentals = 2 * B * C * (2 * F + 2)
    bytes_accessed = (B * C * H
                      + H * H + 2 * H * F + 3 * C * H + H + 2 * F + 3 * C
                      + B * C * 2 * F + 3 * B * C) * itemsize

    fn = pl.pallas_call(
        _le_head_kernel,
        out_shape=out_shape,
        grid_spec=pltpu.PrefetchScalarGridSpec(
            num_scalar_prefetch=0,
            grid=grid,
            in_specs=in_specs,
            out_specs=out_specs,
        ),
        compiler_params=pltpu.CompilerParams(
            dimension_semantics=("parallel",),
            vmem_limit_bytes=vmem_limit,
        ),
        cost_estimate=pl.CostEstimate(
            flops=flops,
            transcendentals=transcendentals,
            bytes_accessed=bytes_accessed,
        ),
    )
    z, gw = fn(features, w1, b1, w2, b2, w3, b3)
    z_mu = z[..., :F]          # cheap XLA slices outside the kernel
    z_std = z[..., F:]
    out = gw[:, 0]
    alpha = gw[:, 1]
    beta = gw[:, 2]
    return out, z_mu, z_std, alpha, beta


# TODO(synk): backbone, transformer encoder, input_proj (1x1 Conv2d) and
# query_embed are external modules feeding the encoder; they have no Pallas
# equivalent here, so the kernel consumes the encoder output hs[-1] directly.

if __name__ == "__main__":
    key = jax.random.PRNGKey(0)
    # Small shapes consistent with the module: batch=2, num_class=16,
    # hidden_dim (encoder d_model)=128, feat_dim=64 (so 2*feat_dim = 128 lanes).
    B, C, H, F = 2, 16, 128, 64
    ks = jax.random.split(key, 12)

    stdv = 1.0 / math.sqrt(H)
    features = jax.random.normal(ks[0], (B, C, H), dtype=jnp.float32)
    params = dict(
        w1=jax.random.uniform(ks[1], (H, H), jnp.float32, -stdv, stdv),
        b1=jax.random.uniform(ks[2], (H,), jnp.float32, -stdv, stdv),
        w2=jax.random.uniform(ks[3], (H, 2 * F), jnp.float32, -stdv, stdv),
        b2=jax.random.uniform(ks[4], (2 * F,), jnp.float32, -stdv, stdv),
        wfc=jax.random.uniform(ks[5], (C, H), jnp.float32, -stdv, stdv),
        bfc=jax.random.uniform(ks[6], (C,), jnp.float32, -stdv, stdv),
        wa=jax.random.uniform(ks[7], (C, H), jnp.float32, -stdv, stdv),
        ba=jax.random.uniform(ks[8], (C,), jnp.float32, -stdv, stdv),
        wb=jax.random.uniform(ks[9], (C, H), jnp.float32, -stdv, stdv),
        bb=jax.random.uniform(ks[10], (C,), jnp.float32, -stdv, stdv),
    )

    out, z_mu, z_std, alpha, beta = le_model_smile_head(features, params, feat_dim=F)
    jax.block_until_ready((out, z_mu, z_std, alpha, beta))

    # Beta(alpha, beta).rsample(): stochastic; drawn with jax.random outside Pallas.
    d = jax.random.beta(ks[11], alpha, beta)
    d = jax.block_until_ready(d)

    # ---- plain-JAX reference (mirrors the PyTorch forward exactly) ----
    def softplus(x):
        return jnp.maximum(x, 0.0) + jnp.log1p(jnp.exp(-jnp.abs(x)))

    hi = jnp.einsum("bch,hk->bck", features, params["w1"],
                    precision=jax.lax.Precision.HIGHEST) + params["b1"]
    hi = jnp.maximum(hi, 0.0)
    stats = jnp.einsum("bch,hk->bck", hi, params["w2"],
                       precision=jax.lax.Precision.HIGHEST) + params["b2"]
    z_mu_ref = stats[..., :F]
    z_std_ref = softplus(stats[..., F:])
    out_ref = (params["wfc"][None] * features).sum(-1) + params["bfc"][None]
    alpha_ref = softplus((params["wa"][None] * features).sum(-1) + params["ba"][None]) + 1e-6
    beta_ref = softplus((params["wb"][None] * features).sum(-1) + params["bb"][None]) + 1e-6

    def close(a, b, tol=2e-3):
        return bool(jnp.max(jnp.abs(a.astype(jnp.float32) - b)) < tol)

    assert out.shape == (B, C) and alpha.shape == (B, C) and beta.shape == (B, C)
    assert z_mu.shape == (B, C, F) and z_std.shape == (B, C, F)
    assert close(out, out_ref)
    assert close(z_mu, z_mu_ref)
    assert close(z_std, z_std_ref)
    assert close(alpha, alpha_ref)
    assert close(beta, beta_ref)
    assert bool(jnp.all(jnp.isfinite(d))) and bool(jnp.all((d >= 0.0) & (d <= 1.0)))

    # ---- bf16 smoke test: native bf16 operands straight to the MXU ----
    feat_bf = features.astype(jnp.bfloat16)
    out16, z_mu16, z_std16, alpha16, beta16 = le_model_smile_head(
        feat_bf, params, feat_dim=F)
    jax.block_until_ready((out16, z_mu16, z_std16, alpha16, beta16))
    assert out16.dtype == jnp.bfloat16 and z_mu16.shape == (B, C, F)
    for got, ref in ((out16, out_ref), (z_mu16, z_mu_ref), (z_std16, z_std_ref),
                     (alpha16, alpha_ref), (beta16, beta_ref)):
        assert bool(jnp.all(jnp.isfinite(got.astype(jnp.float32))))
        assert close(got, ref, tol=1e-1)

    print("KERNEL_OK")
</pallas_src>

<mosaic_0001>
module attributes {stable_mosaic.version = 11 : i64} {
  func.func @_le_head_kernel(%arg0: i32, %arg1: memref<1x16x128xf32, #tpu.memory_space<vmem>>, %arg2: memref<128x128xf32, #tpu.memory_space<vmem>>, %arg3: memref<1x128xf32, #tpu.memory_space<vmem>>, %arg4: memref<128x128xf32, #tpu.memory_space<vmem>>, %arg5: memref<1x128xf32, #tpu.memory_space<vmem>>, %arg6: memref<3x16x128xf32, #tpu.memory_space<vmem>>, %arg7: memref<3x16xf32, #tpu.memory_space<vmem>>, %arg8: memref<1x16x128xf32, #tpu.memory_space<vmem>>, %arg9: memref<1x3x16xf32, #tpu.memory_space<vmem>>) attributes {dimension_semantics = [#tpu.dimension_semantics<parallel>], iteration_bounds = array<i64: 2>, scalar_prefetch = 0 : i64, scratch_operands = 0 : i64, tpu.core_type = #tpu.core_type<tc>, window_params = [{transform_indices = @transform_0, window_bounds = array<i64: 1, 16, 128>}, {pipeline_mode = #tpu.pipeline_mode<synchronous>, transform_indices = @transform_1, window_bounds = array<i64: 128, 128>}, {pipeline_mode = #tpu.pipeline_mode<synchronous>, transform_indices = @transform_2, window_bounds = array<i64: 1, 128>}, {pipeline_mode = #tpu.pipeline_mode<synchronous>, transform_indices = @transform_3, window_bounds = array<i64: 128, 128>}, {pipeline_mode = #tpu.pipeline_mode<synchronous>, transform_indices = @transform_4, window_bounds = array<i64: 1, 128>}, {pipeline_mode = #tpu.pipeline_mode<synchronous>, transform_indices = @transform_5, window_bounds = array<i64: 3, 16, 128>}, {pipeline_mode = #tpu.pipeline_mode<synchronous>, transform_indices = @transform_6, window_bounds = array<i64: 3, 16>}, {transform_indices = @transform_7, window_bounds = array<i64: 1, 16, 128>}, {transform_indices = @transform_8, window_bounds = array<i64: 1, 3, 16>}]} {
    %c0 = arith.constant 0 : index
    %c0_0 = arith.constant 0 : index
    %c0_1 = arith.constant 0 : index
    %0 = vector.load %arg1[%c0, %c0_0, %c0_1] : memref<1x16x128xf32, #tpu.memory_space<vmem>>, vector<1x16x128xf32>
    %1 = vector.shape_cast %0 : vector<1x16x128xf32> to vector<16x128xf32>
    %c0_2 = arith.constant 0 : index
    %c0_3 = arith.constant 0 : index
    %2 = vector.load %arg2[%c0_2, %c0_3] : memref<128x128xf32, #tpu.memory_space<vmem>>, vector<128x128xf32>
    %cst = arith.constant dense<0.000000e+00> : vector<16x128xf32>
    %3 = tpu.matmul %1, %2, %cst {dimension_numbers = #tpu.dot_dimension_numbers<[1], [0], [0], [1], [0, 0, 1, 1], [], []>} : vector<16x128xf32>, vector<128x128xf32>, vector<16x128xf32> -> vector<16x128xf32>
    %c0_4 = arith.constant 0 : index
    %c0_5 = arith.constant 0 : index
    %4 = vector.load %arg3[%c0_4, %c0_5] : memref<1x128xf32, #tpu.memory_space<vmem>>, vector<1x128xf32>
    %5 = vector.broadcast %4 : vector<1x128xf32> to vector<16x128xf32>
    %6 = arith.addf %3, %5 : vector<16x128xf32>
    %cst_6 = arith.constant 0.000000e+00 : f32
    %7 = vector.broadcast %cst_6 : f32 to vector<16x128xf32>
    %8 = arith.maximumf %6, %7 : vector<16x128xf32>
    %c0_7 = arith.constant 0 : index
    %c0_8 = arith.constant 0 : index
    %9 = vector.load %arg4[%c0_7, %c0_8] : memref<128x128xf32, #tpu.memory_space<vmem>>, vector<128x128xf32>
    %cst_9 = arith.constant dense<0.000000e+00> : vector<16x128xf32>
    %10 = tpu.matmul %8, %9, %cst_9 {dimension_numbers = #tpu.dot_dimension_numbers<[1], [0], [0], [1], [0, 0, 1, 1], [], []>} : vector<16x128xf32>, vector<128x128xf32>, vector<16x128xf32> -> vector<16x128xf32>
    %c0_10 = arith.constant 0 : index
    %c0_11 = arith.constant 0 : index
    %11 = vector.load %arg5[%c0_10, %c0_11] : memref<1x128xf32, #tpu.memory_space<vmem>>, vector<1x128xf32>
    %12 = vector.broadcast %11 : vector<1x128xf32> to vector<16x128xf32>
    %13 = arith.addf %10, %12 : vector<16x128xf32>
    %14 = tpu.iota {dimensions = array<i32: 1>} : vector<16x128xi32>
    %c64_i32 = arith.constant 64 : i32
    %15 = vector.broadcast %c64_i32 : i32 to vector<16x128xi32>
    %16 = arith.cmpi sge, %14, %15 : vector<16x128xi32>
    %cst_12 = arith.constant 0.000000e+00 : f32
    %17 = vector.broadcast %cst_12 : f32 to vector<16x128xf32>
    %18 = arith.maximumf %13, %17 : vector<16x128xf32>
    %19 = math.absf %13 : vector<16x128xf32>
    %cst_13 = arith.constant 0.000000e+00 : f32
    %20 = vector.broadcast %cst_13 : f32 to vector<16x128xf32>
    %21 = arith.subf %20, %19 : vector<16x128xf32>
    %22 = math.exp %21 : vector<16x128xf32>
    %23 = math.log1p %22 : vector<16x128xf32>
    %24 = arith.addf %18, %23 : vector<16x128xf32>
    %25 = arith.select %16, %24, %13 : vector<16x128xi1>, vector<16x128xf32>
    %26 = vector.shape_cast %25 : vector<16x128xf32> to vector<1x16x128xf32>
    %c0_14 = arith.constant 0 : index
    %c0_15 = arith.constant 0 : index
    %c0_16 = arith.constant 0 : index
    %27 = vector.load %arg8[%c0_14, %c0_15, %c0_16] : memref<1x16x128xf32, #tpu.memory_space<vmem>>, vector<1x16x128xf32>
    tpu.vector_store %arg8[%c0_14, %c0_15, %c0_16], %26 {strides = array<i32>} : memref<1x16x128xf32, #tpu.memory_space<vmem>>, vector<1x16x128xf32>,
    %c0_17 = arith.constant 0 : index
    %c0_18 = arith.constant 0 : index
    %c0_19 = arith.constant 0 : index
    %28 = vector.load %arg6[%c0_17, %c0_18, %c0_19] : memref<3x16x128xf32, #tpu.memory_space<vmem>>, vector<3x16x128xf32>
    %29 = vector.shape_cast %0 : vector<1x16x128xf32> to vector<1x1x16x128xf32>
    %30 = vector.shape_cast %28 : vector<3x16x128xf32> to vector<1x3x16x128xf32>
    %31 = vector.broadcast %29 : vector<1x1x16x128xf32> to vector<1x3x16x128xf32>
    %32 = arith.mulf %31, %30 : vector<1x3x16x128xf32>
    %cst_20 = arith.constant dense<0.000000e+00> : vector<1x3x16xf32>
    %33 = vector.multi_reduction <add>, %32, %cst_20 [3] : vector<1x3x16x128xf32> to vector<1x3x16xf32>
    %c0_21 = arith.constant 0 : index
    %c0_22 = arith.constant 0 : index
    %34 = vector.load %arg7[%c0_21, %c0_22] : memref<3x16xf32, #tpu.memory_space<vmem>>, vector<3x16xf32>
    %35 = vector.shape_cast %34 : vector<3x16xf32> to vector<1x3x16xf32>
    %36 = arith.addf %33, %35 : vector<1x3x16xf32>
    %37 = tpu.iota {dimensions = array<i32: 1>} : vector<1x3x16xi32>
    %c1_i32 = arith.constant 1 : i32
    %38 = vector.broadcast %c1_i32 : i32 to vector<1x3x16xi32>
    %39 = arith.cmpi sge, %37, %38 : vector<1x3x16xi32>
    %cst_23 = arith.constant 0.000000e+00 : f32
    %40 = vector.broadcast %cst_23 : f32 to vector<1x3x16xf32>
    %41 = arith.maximumf %36, %40 : vector<1x3x16xf32>
    %42 = math.absf %36 : vector<1x3x16xf32>
    %cst_24 = arith.constant 0.000000e+00 : f32
    %43 = vector.broadcast %cst_24 : f32 to vector<1x3x16xf32>
    %44 = arith.subf %43, %42 : vector<1x3x16xf32>
    %45 = math.exp %44 : vector<1x3x16xf32>
    %46 = math.log1p %45 : vector<1x3x16xf32>
    %47 = arith.addf %41, %46 : vector<1x3x16xf32>
    %cst_25 = arith.constant 9.99999997E-7 : f32
    %48 = vector.broadcast %cst_25 : f32 to vector<1x3x16xf32>
    %49 = arith.addf %47, %48 : vector<1x3x16xf32>
    %50 = arith.select %39, %49, %36 : vector<1x3x16xi1>, vector<1x3x16xf32>
    %c0_26 = arith.constant 0 : index
    %c0_27 = arith.constant 0 : index
    %c0_28 = arith.constant 0 : index
    %51 = vector.load %arg9[%c0_26, %c0_27, %c0_28] : memref<1x3x16xf32, #tpu.memory_space<vmem>>, vector<1x3x16xf32>
    tpu.vector_store %arg9[%c0_26, %c0_27, %c0_28], %50 {strides = array<i32>} : memref<1x3x16xf32, #tpu.memory_space<vmem>>, vector<1x3x16xf32>,
    return
  }
  func.func @transform_0(%arg0: i32) -> (i32, i32, i32) {
    %c0_i32 = arith.constant 0 : i32
    %c0_i32_0 = arith.constant 0 : i32
    %c0_i32_1 = arith.constant 0 : i32
    return %arg0, %c0_i32, %c0_i32_0 : i32, i32, i32
  }
  func.func @transform_1(%arg0: i32) -> (i32, i32) {
    %c0_i32 = arith.constant 0 : i32
    %c0_i32_0 = arith.constant 0 : i32
    %c0_i32_1 = arith.constant 0 : i32
    return %c0_i32, %c0_i32_0 : i32, i32
  }
  func.func @transform_2(%arg0: i32) -> (i32, i32) {
    %c0_i32 = arith.constant 0 : i32
    %c0_i32_0 = arith.constant 0 : i32
    %c0_i32_1 = arith.constant 0 : i32
    return %c0_i32, %c0_i32_0 : i32, i32
  }
  func.func @transform_3(%arg0: i32) -> (i32, i32) {
    %c0_i32 = arith.constant 0 : i32
    %c0_i32_0 = arith.constant 0 : i32
    %c0_i32_1 = arith.constant 0 : i32
    return %c0_i32, %c0_i32_0 : i32, i32
  }
  func.func @transform_4(%arg0: i32) -> (i32, i32) {
    %c0_i32 = arith.constant 0 : i32
    %c0_i32_0 = arith.constant 0 : i32
    %c0_i32_1 = arith.constant 0 : i32
    return %c0_i32, %c0_i32_0 : i32, i32
  }
  func.func @transform_5(%arg0: i32) -> (i32, i32, i32) {
    %c0_i32 = arith.constant 0 : i32
    %c0_i32_0 = arith.constant 0 : i32
    %c0_i32_1 = arith.constant 0 : i32
    %c0_i32_2 = arith.constant 0 : i32
    return %c0_i32, %c0_i32_0, %c0_i32_1 : i32, i32, i32
  }
  func.func @transform_6(%arg0: i32) -> (i32, i32) {
    %c0_i32 = arith.constant 0 : i32
    %c0_i32_0 = arith.constant 0 : i32
    %c0_i32_1 = arith.constant 0 : i32
    return %c0_i32, %c0_i32_0 : i32, i32
  }
  func.func @transform_7(%arg0: i32) -> (i32, i32, i32) {
    %c0_i32 = arith.constant 0 : i32
    %c0_i32_0 = arith.constant 0 : i32
    %c0_i32_1 = arith.constant 0 : i32
    return %arg0, %c0_i32, %c0_i32_0 : i32, i32, i32
  }
  func.func @transform_8(%arg0: i32) -> (i32, i32, i32) {
    %c0_i32 = arith.constant 0 : i32
    %c0_i32_0 = arith.constant 0 : i32
    %c0_i32_1 = arith.constant 0 : i32
    return %arg0, %c0_i32, %c0_i32_0 : i32, i32, i32
  }
}

</mosaic_0001>

<bundles_post_ra>
// kernel: tpu_custom_call.1
= control target key start
LH: loop header
LB: loop body
LE: loop exit
PB: predicated region body
PF: predicated region fallthrough
CT: control target
= control target key end

     0   :  { %14 = vsyncpa [#allocation3], 0  ;;  %s1974_s0 = inlined_call_operand.hbm [shape: f32[2,16,128], index: 0, kind: input, shape index: {}]   ;;  %s1975_s1 = inlined_call_operand.hbm [shape: f32[128,128], index: 1, kind: input, shape index: {}]   ;;  %s1976_s2 = inlined_call_operand.vmem [shape: f32[1,128], index: 2, kind: input, shape index: {}]   ;;  %s1977_s3 = inlined_call_operand.hbm [shape: f32[128,128], index: 3, kind: input, shape index: {}]   ;;  %s1978_s4 = inlined_call_operand.vmem [shape: f32[1,128], index: 4, kind: input, shape index: {}]   ;;  %s1979_s5 = inlined_call_operand.hbm [shape: f32[3,16,128], index: 5, kind: input, shape index: {}]   ;;  %s1980_s6 = inlined_call_operand.vmem [shape: f32[3,16], index: 6, kind: input, shape index: {}]   ;;  %s1981_s7 = inlined_call_operand.hbm [shape: f32[2,16,128], index: 7, kind: output, shape index: {0}]   ;;  %s1982_s8 = inlined_call_operand.vmem [shape: f32[2,3,16], index: 8, kind: output, shape index: {1}]  }
   0x1   :  { %16 = vsyncpa [#allocation3 + $0x1], 0 }
   0x2   :  { %17 = vsyncpa [#allocation6], 0 }
   0x3   :  { %18 = vsyncpa [#allocation9], 0 }
   0x4   :  { %19 = vsyncpa [#allocation4], 0 }
   0x5   :  { %21 = vsyncpa [#allocation4 + $0x1], 0  ;;  %s1604_s27 = smov 0   ;;  %s1606_s28 = smov 0  }
   0x6   :  { %s1608_s29 = smov 0   ;;  %s1610_s30 = smov 0  }
   0x7 LB: > { %1988 = sst [smem:[#allocation15_spill]] %s1535_s27  ;;  %s1625_s9 = sadd.s32 4294967295, %s1547_s30   ;;  %s1547_s30 = sphi %s1610_s30, %s2019_s30   ;;  %s1543_s29 = sphi %s1608_s29, %s2018_s29   ;;  %s1539_s28 = sphi %s1606_s28, %s2017_s28   ;;  %s1535_s27 = sphi %s1604_s27, %s2016_s27  }
   0x8   : > { %s1048_s10 = sadd.s32 4294967294, %s1547_s30   ;;  %p47_p0 = scmp.ne.s32.totalorder %s1539_s28, %s1535_s27 }
   0x9   : > { %p1983_p1 = scmp.eq.s32.totalorder %s1625_s9, 0  ;;  %p203_p3 = scmp.eq.s32.totalorder %s1048_s10, 1 }
   0xa   : > { %p1049_p5 = scmp.ge.s32.totalorder %s1547_s30, 1  ;;  %p236_p7 = scmp.lt.s32.totalorder %s1547_s30, 3 }
   0xb   : > { %p1634_p4 = por %p1983_p1, %p47_p0  ;;  %p1639_p6 = por %p203_p3, %p47_p0 }
   0xc   : > { %p1644_p8 = pnand %p1049_p5, %p236_p7  ;;  %s1549_s14 = smov [#allocation5]  }
   0xd   : > { %s1989_s11 = scalar_select %p1634_p4, 1, 0 }
   0xe   : > { %s1990_s12 = scalar_select %p1639_p6, 1, 0 }
   0xf   : > { %s1992_s13 = scalar_select %p1644_p8, 1, 0 }
  0x10   : > { %1991 = sst [smem:[#allocation16_spill]] %s1990_s12  ;;  %s248_s15 = sshll.u32 %s1549_s14, 4  ;;  %s1648_s15 = int_to_ptr.vmem [resolvable:$true] %s248_s15 }
  0x11   : > { %p1259_p9 = pneg %p1644_p8  ;;  %s1550_s17 = smov [#allocation7]  }
  0x12   : > { %s264_s18 = sshll.u32 %s1550_s17, 4  ;;  %s1551_s19 = smov [#allocation8]   ;;  %s1659_s18 = int_to_ptr.vmem [resolvable:$true] %s264_s18 }
  0x13   : > { %p1655_p11 = pnand %p1259_p9, %p1983_p1  ;;  %s1661_s20 = sshll.u32 %s1551_s19, 4  ;;  %s281_s20 = int_to_ptr.vmem [resolvable:$true] %s1661_s20 }
  0x14   : > { %s1359_s23 = scalar_lea.hbm %s1975_s1, 2048 }
  0x15   : > { %p1360_p12 = scmp.ne.s32.totalorder %s1975_s1, %s1359_s23  ;;  %p1671_p13 = pneg %p1655_p11 }
  0x16   : > { %p1366_p5 = scmp.lt.u32.totalorder %s1359_s23, %s1975_s1 }
  0x17   : > { %p1362_p0 = pnand %p1671_p13, %p1360_p12 }
  0x19   : > { %p1363_p3 = pneg %p1362_p0 }
  0x1b   : > { %p1368_p7 = pnand %p1366_p5, %p1363_p3 }
  0x1d   : > { %1371 = shalt.err (!%p1368_p7)
}
  0x1e   : > { %s1372_s17 = scalar_lea.vmem %s1648_s15, 2048  ;;  %p1380_p2 = scmp.lt.s32.totalorder %s1648_s15, %s1648_s15 }
  0x1f   : > { %p1373_p9 = scmp.ne.s32.totalorder %s1648_s15, %s1372_s17  ;;  %p1381_p6 = scmp.lt.s32.totalorder %s1372_s17, %s1372_s17 }
  0x21   : > { %p1375_p10 = pnand %p1373_p9, %p1671_p13  ;;  %p1382_p12 = por %p1381_p6, %p1380_p2 }
  0x23   : > { %p1376_p1 = pneg %p1375_p10 }
  0x25   : > { %p1383_p0 = pnand %p1382_p12, %p1376_p1 }
  0x27   : > { %1386 = shalt.err (!%p1383_p0)
}
  0x28   : > { %s1552_s19 = smov 128   ;;  %s1553_s21 = smov 8  }
  0x29   : > { %1262 = dma.hbm_to_vmem [thread:$0]  (!%p1655_p11), %s1975_s1, 2048, %s1648_s15, [#allocation6], %s1552_s19, %s1552_s19, %s1553_s21  }
  0x2a   : > { %s1387_s10 = scalar_lea.hbm %s1977_s3, 2048 }
  0x2b   : > { %p1388_p1 = scmp.ne.s32.totalorder %s1977_s3, %s1387_s10  ;;  %p1394_p10 = scmp.lt.u32.totalorder %s1387_s10, %s1977_s3 }
  0x2d   : > { %p1390_p2 = pnand %p1388_p1, %p1671_p13 }
  0x2f   : > { %p1391_p6 = pneg %p1390_p2 }
  0x31   : > { %p1396_p3 = pnand %p1394_p10, %p1391_p6 }
  0x33   : > { %1399 = shalt.err (!%p1396_p3)
}
  0x34   : > { %s1400_s15 = scalar_lea.vmem %s1659_s18, 2048  ;;  %p1408_p12 = scmp.lt.s32.totalorder %s1659_s18, %s1659_s18 }
  0x35   : > { %p1401_p5 = scmp.ne.s32.totalorder %s1659_s18, %s1400_s15  ;;  %p1409_p0 = scmp.lt.s32.totalorder %s1400_s15, %s1400_s15 }
  0x37   : > { %p1403_p7 = pnand %p1401_p5, %p1671_p13  ;;  %p1410_p1 = por %p1409_p0, %p1408_p12 }
  0x39   : > { %p1404_p9 = pneg %p1403_p7 }
  0x3b   : > { %p1411_p2 = pnand %p1410_p1, %p1404_p9 }
  0x3d   : > { %1414 = shalt.err (!%p1411_p2)
}
  0x3e   : > { %1265 = dma.hbm_to_vmem [thread:$0]  (!%p1655_p11), %s1977_s3, 2048, %s1659_s18, [#allocation6], %s1552_s19, %s1552_s19, %s1553_s21  }
  0x3f   : > { %s1415_s24 = scalar_lea.hbm %s1979_s5, 768 }
  0x40   : > { %p1416_p6 = scmp.ne.s32.totalorder %s1979_s5, %s1415_s24  ;;  %p1422_p5 = scmp.lt.u32.totalorder %s1415_s24, %s1979_s5 }
  0x42   : > { %p1418_p10 = pnand %p1416_p6, %p1671_p13 }
  0x44   : > { %p1419_p3 = pneg %p1418_p10 }
  0x46   : > { %p1424_p7 = pnand %p1422_p5, %p1419_p3 }
  0x48   : > { %1427 = shalt.err (!%p1424_p7)
}
  0x49   : > { %s1428_s15 = scalar_lea.vmem %s281_s20, 768  ;;  %p1436_p1 = scmp.lt.s32.totalorder %s281_s20, %s281_s20 }
  0x4a   : > { %p1429_p9 = scmp.ne.s32.totalorder %s281_s20, %s1428_s15  ;;  %p1437_p2 = scmp.lt.s32.totalorder %s1428_s15, %s1428_s15 }
  0x4c   : > { %p1431_p12 = pnand %p1429_p9, %p1671_p13  ;;  %p1438_p4 = por %p1437_p2, %p1436_p1 }
  0x4e   : > { %p1432_p0 = pneg %p1431_p12 }
  0x50   : > { %p1439_p8 = pnand %p1438_p4, %p1432_p0 }
  0x52   : > { %1442 = shalt.err (!%p1439_p8)
}
  0x53   : > { %1268 = dma.hbm_to_vmem [thread:$0]  (!%p1655_p11), %s1979_s5, 768, %s281_s20, [#allocation9], %s1552_s19, %s1552_s19, %s1553_s21  }
  0x54   : > { %s1744_s26 = sadd.s32 1, %s1547_s30   ;;  %s34_s12 = sadd.s32 1, %s1543_s29 }
  0x55   : > { %s31_s16 = ssub.s32 %s1547_s30, %s1744_s26  ;;  %p41_p8 = scmp.ne.s32.totalorder %s1543_s29, %s1539_s28 }
  0x56   : > { %p32_p4 = scmp.eq.s32.totalorder %s31_s16, 0  ;;  %p42_p13 = scmp.eq.s32.totalorder %s1547_s30, 0 }
  0x57   : > { %p1280_p6 = scmp.lt.s32.totalorder %s1547_s30, 2  ;;  %p1995_p3 = scmp.eq.s32.totalorder %s1625_s9, 1 }
  0x58   : > { %s1754_s22 = scalar_select %p32_p4, %s1543_s29, %s34_s12  }
  0x59   : > { %p43_p10 = por %p42_p13, %p41_p8  ;;  %p1758_p5 = por %p1995_p3, %p41_p8 }
  0x5a   : > { %s297_s24 = sand.u32 1, %s1543_s29   ;;  %s1071_s25 = sshll.u32 %s1547_s30, 8 }
  0x5b   : > { %s1054_s20 = sshll.u32 %s297_s24, 4  ;;  %s1767_s17 = scalar_lea.hbm %s1974_s0, %s1071_s25 }
  0x5c   : > { %s301_s15 = scalar_lea.vmem [#allocation2], %s1054_s20  ;;  %p1769_p11 = pnand %p1280_p6, %p43_p10 }
  0x5d   : > { %s308_s18 = sshll.u32 %s301_s15, 4  ;;  %s1775_s16 = scalar_lea.sflag [#allocation3], %s297_s24  ;;  %s1773_s18 = int_to_ptr.vmem [resolvable:$true] %s308_s18 }
  0x5e   : > { %s1443_s12 = scalar_lea.hbm %s1767_s17, 256  ;;  %p1445_p9 = pneg %p1769_p11 }
  0x5f   : > { %p1444_p7 = scmp.ne.s32.totalorder %s1767_s17, %s1443_s12  ;;  %s1448_s10 = scalar_lea.hbm %s1974_s0, 512 }
  0x60   : > { %p1449_p1 = scmp.lt.u32.totalorder %s1767_s17, %s1974_s0  ;;  %p1450_p2 = scmp.lt.u32.totalorder %s1448_s10, %s1443_s12 }
  0x61   : > { %p1446_p12 = pnand %p1445_p9, %p1444_p7  ;;  %p1452_p8 = scmp.lt.u32.totalorder %s1443_s12, %s1767_s17 }
  0x62   : > { %p1451_p4 = por %p1450_p2, %p1449_p1 }
  0x63   : > { %p1447_p0 = pneg %p1446_p12 }
  0x64   : > { %p1453_p13 = por %p1452_p8, %p1451_p4 }
  0x66   : > { %p1454_p6 = pnand %p1453_p13, %p1447_p0 }
  0x68   : > { %1457 = shalt.err (!%p1454_p6)
}
  0x69   : > { %s1458_s24 = scalar_lea.vmem %s1773_s18, 256  ;;  %s1554_s25 = smov [#allocation2]  }
  0x6a   : > { %p1459_p10 = scmp.ne.s32.totalorder %s1773_s18, %s1458_s24  ;;  %s1463_s20 = sshll.u32 %s1554_s25, 4  ;;  %s1464_s20 = int_to_ptr.vmem [resolvable:$false] %s1463_s20 }
  0x6b   : > { %s1465_s14 = scalar_lea.vmem %s1464_s20, 512  ;;  %p1466_p12 = scmp.lt.s32.totalorder %s1773_s18, %s1464_s20 }
  0x6c   : > { %p1461_p3 = pnand %p1459_p10, %p1445_p9  ;;  %p1467_p1 = scmp.lt.s32.totalorder %s1465_s14, %s1458_s24 }
  0x6e   : > { %p1462_p7 = pneg %p1461_p3  ;;  %p1468_p2 = por %p1467_p1, %p1466_p12 }
  0x70   : > { %p1469_p4 = pnand %p1468_p2, %p1462_p7 }
  0x72   : > { %1472 = shalt.err (!%p1469_p4)
}
  0x73   : > { %1272 = dma.hbm_to_vmem [thread:$0]  (!%p1769_p11), %s1767_s17, 256, %s1773_s18, %s1775_s16, %s1552_s19, %s1552_s19, %s1553_s21  }
  0x74   : > { %p1998_p9 = scmp.ne.s32.totalorder %s1992_s13, 0 }
  0x75   : > { %s1809_s12 = sand.u32 (!%p1998_p9), 1, %s1539_s28   ;;  %p1999_p0 = scmp.ne.s32.totalorder (!%p1998_p9), %s1989_s11, 0 }
  0x76   : > { %320 = sbr.rel (%p1998_p9) target bundleno = 652 (0x28c), region = 48  ;;  %s1058_s10 = sshll.u32 (!%p1998_p9), %s1809_s12, 4 }
  0x77   : > { %s323_s15 = scalar_lea.sflag (!%p1998_p9), [#allocation3], %s1809_s12  ;;  %s326_s27 = scalar_lea.vmem (!%p1998_p9), [#allocation2], %s1058_s10 }
  0x7d   : > { %1518 = dma.done.wait (%p1999_p0), %s323_s15, 256  }
  0x7e   : > { %1520 = vsyncadd (%p1999_p0), %s323_s15, 4294967040  ;;  %p2000_p11 = scmp.eq.s32.totalorder %s1625_s9, 0 }
  0x80   : > { %1522 = dma.done.wait (%p2000_p11), [#allocation6], 4096   ;;  %p2001_p8 = pmov %p2000_p11 }
  0x82   : > { %1524 = vsyncadd (%p2001_p8), [#allocation6], 4294963200  ;;  %p2002_p13 = pmov %p2001_p8 }
  0x83   : > { %p2003_p6 = pmov %p2001_p8 }
  0x84   : > { %1526 = dma.done.wait (%p2002_p13), [#allocation9], 768  }
  0x85   : > { %1528 = vsyncadd (%p2003_p6), [#allocation9], 4294966528  ;;  %v381_v0 = vld [vmem:[#allocation5] sm:$0xff]  ;;  %v382_v1 = vld [vmem:[#allocation5 + $0x8] sm:$0xff]  ;;  %v579_v45 = vlaneseq  ;;  %p375_p10 = scmp.lt.s32.totalorder %s1625_s9, 1  ;;  %vm819_vm6 = vcmask 130112  }
  0x86   : > { %v383_v2 = vld [vmem:[#allocation5 + $0x10] sm:$0xff]  ;;  %v1179_v3 = vpack.c.bf16 %v382_v1, %v381_v0  ;;  %v384_v4 = vld [vmem:[#allocation5 + $0x18] sm:$0xff]  ;;  %v385_v6 = vld [vmem:[#allocation5 + $0x20] sm:$0xff]  ;;  %vm839_vm7 = vcmask 1041409   ;;  %vm841_vm8 = vcmask 1042434   ;;  %vm899_vm10 = vcmask 124928  }
  0x87   : > { %v1183_v5 = vpack.c.bf16 %v384_v4, %v383_v2  ;;  %v386_v7 = vld [vmem:[#allocation5 + $0x28] sm:$0xff]  ;;  %v387_v9 = vld [vmem:[#allocation5 + $0x30] sm:$0xff]  ;;  %v388_v10 = vld [vmem:[#allocation5 + $0x38] sm:$0xff]  ;;  %v1833_v52 = vshrl.u32 %v579_v45, 7  ;;  %s376_s17 = scalar_select %p375_p10, %s1625_s9, 1 }
  0x88   : > { %1180 = vmatprep.subr.bf16.mxu0 %v1179_v3  ;;  %v1187_v8 = vpack.c.bf16 %v386_v7, %v385_v6  ;;  %v379_v11 = vld [vmem:[%s326_s27] sm:$0xff]  ;;  %v619_v13 = vld [vmem:[#allocation8 + $0x18] sm:$0xff]  ;;  %v617_v17 = vld [vmem:[#allocation8 + $0x8] sm:$0xff]  ;;  %v1191_v21 = vpack.c.bf16 %v388_v10, %v387_v9  ;;  %v1555_v7 = vmov 0   ;;  %s368_s15 = scalar_lea.vmem [#allocation10], %s1058_s10  ;;  %s1072_s11 = sshll.u32 %s1625_s9, 8 }
  0x89   : > { %1182 = vmatpush3.bf16.msra.mxu0 %v1179_v3  ;;  %1141 = vmatprep.mubr.f32.mxu0 %v379_v11  ;;  %v618_v12 = vld [vmem:[#allocation8 + $0x10] sm:$0xff]  ;;  %v616_v14 = vld [vmem:[#allocation8] sm:$0xff]  ;;  %v1827_v18 = vld [vmem:[%s326_s27 + $0x8] sm:$0xff]  ;;  %v644_v57 = vsub.s32 0, %v1833_v52  ;;  %v655_v63 = vsub.s32 1, %v1833_v52  ;;  %v666_v2 = vsub.s32 2, %v1833_v52  ;;  %s1930_s19 = scalar_lea.hbm %s1981_s7, %s1072_s11 }
  0x8a   : > { %1184 = vmatprep.subr.bf16.mxu0 %v1183_v5  ;;  %v624_v15 = vmul.f32 %v618_v12, %v379_v11  ;;  %v622_v16 = vmul.f32 %v616_v14, %v379_v11  ;;  %v481_v19 = vld [vmem:[#allocation7] sm:$0xff]  ;;  %v482_v20 = vld [vmem:[#allocation7 + $0x8] sm:$0xff]  ;;  %v625_v22 = vmul.f32 %v619_v13, %v1827_v18  ;;  %v483_v23 = vld [vmem:[#allocation7 + $0x10] sm:$0xff]  ;;  %v623_v28 = vmul.f32 %v617_v17, %v1827_v18  ;;  %s1063_s18 = sshll.u32 %s376_s17, 2  ;;  %s919_s27 = sshll.u32 %s368_s15, 4  ;;  %s1925_s27 = int_to_ptr.vmem [resolvable:$true] %s919_s27 }
  0x8b   : > { %v484_v24 = vld [vmem:[#allocation7 + $0x18] sm:$0xff]  ;;  %v389_v25 = vld [vmem:[#allocation5 + $0x40] sm:$0xff]  ;;  %v390_v26 = vld [vmem:[#allocation5 + $0x48] sm:$0xff]  ;;  %v1211_v29 = vpack.c.bf16 %v482_v20, %v481_v19  ;;  %1326 = vset.pattern.permute.xlu0 %v1555_v7  ;;  %1325 = vset.pattern.permute.xlu1 %v1555_v7  ;;  %vm689_vm9 = vcmp.ge.s32.totalorder %v1833_v52, 1  ;;  %s378_s25 = scalar_lea.vmem %s1982_s8, %s1063_s18  ;;  %s902_s9 = scalar_lea.sflag [#allocation4], %s1809_s12 }
  0x8c   : > { %632 = vadd.xlane.f32.xlu1 %v624_v15  ;;  %628 = vadd.xlane.f32.xlu0 %v622_v16  ;;  %v621_v27 = vld [vmem:[#allocation8 + $0x28] sm:$0xff]  ;;  %v620_v30 = vld [vmem:[#allocation8 + $0x20] sm:$0xff]  ;;  %v1215_v31 = vpack.c.bf16 %v484_v24, %v483_v23  ;;  %v1195_v34 = vpack.c.bf16 %v390_v26, %v389_v25  ;;  %v391_v36 = vld [vmem:[#allocation5 + $0x50] sm:$0xff]  ;;  %s1473_s21 = scalar_lea.vmem %s1925_s27, 256  ;;  %s1556_s17 = smov [#allocation10]  }
  0x8d   : > { %1186 = vmatpush3.bf16.msra.mxu0 %v1183_v5  ;;  %1212 = vmatprep.subr.bf16.mxu1 %v1211_v29  ;;  %v485_v32 = vld [vmem:[#allocation7 + $0x20] sm:$0xff]  ;;  %v486_v33 = vld [vmem:[#allocation7 + $0x28] sm:$0xff]  ;;  %v627_v35 = vmul.f32 %v621_v27, %v1827_v18  ;;  %v392_v37 = vld [vmem:[#allocation5 + $0x58] sm:$0xff]  ;;  %v626_v38 = vmul.f32 %v620_v30, %v379_v11  ;;  %p1474_p3 = scmp.ne.s32.totalorder %s1925_s27, %s1473_s21  ;;  %s1477_s18 = sshll.u32 %s1556_s17, 4  ;;  %s1478_s18 = int_to_ptr.vmem [resolvable:$false] %s1477_s18 }
  0x8e   : > { %1188 = vmatprep.subr.bf16.mxu0 %v1187_v8  ;;  %1214 = vmatpush3.bf16.msra.mxu1 %v1211_v29  ;;  %v1219_v39 = vpack.c.bf16 %v486_v33, %v485_v32  ;;  %v487_v40 = vld [vmem:[#allocation7 + $0x30] sm:$0xff]  ;;  %v488_v41 = vld [vmem:[#allocation7 + $0x38] sm:$0xff]  ;;  %v1199_v42 = vpack.c.bf16 %v392_v37, %v391_v36  ;;  %v393_v43 = vld [vmem:[#allocation5 + $0x60] sm:$0xff]  ;;  %s1479_s16 = scalar_lea.vmem %s1478_s18, 512  ;;  %p1480_p1 = scmp.lt.s32.totalorder %s1925_s27, %s1478_s18 }
  0x8f   : > { %1216 = vmatprep.subr.bf16.mxu1 %v1215_v31  ;;  %v394_v44 = vld [vmem:[#allocation5 + $0x68] sm:$0xff]  ;;  %v1223_v46 = vpack.c.bf16 %v488_v41, %v487_v40  ;;  %v489_v47 = vld [vmem:[#allocation7 + $0x40] sm:$0xff]  ;;  %v395_v50 = vld [vmem:[#allocation5 + $0x70] sm:$0xff]  ;;  %p1475_p7 = pnand %p1474_p3, %p1758_p5  ;;  %p1481_p2 = scmp.lt.s32.totalorder %s1479_s16, %s1473_s21 }
  0x90   : > { %634 = vadd.xlane.f32.xlu1 %v625_v22  ;;  %630 = vadd.xlane.f32.xlu0 %v623_v28  ;;  %v490_v48 = vld [vmem:[#allocation7 + $0x48] sm:$0xff]  ;;  %v1203_v49 = vpack.c.bf16 %v394_v44, %v393_v43  ;;  %v396_v51 = vld [vmem:[#allocation5 + $0x78] sm:$0xff]  ;;  %v491_v54 = vld [vmem:[#allocation7 + $0x50] sm:$0xff] }
  0x91   : > { %1190 = vmatpush3.bf16.msra.mxu0 %v1187_v8  ;;  %v1227_v53 = vpack.c.bf16 %v490_v48, %v489_v47  ;;  %v492_v55 = vld [vmem:[#allocation7 + $0x58] sm:$0xff]  ;;  %v1207_v56 = vpack.c.bf16 %v396_v51, %v395_v50  ;;  %v640_v58 = vld [vmem:[%s1980_s6] sm:$0x7]  ;;  %v494_v61 = vld [vmem:[#allocation7 + $0x68] sm:$0xff]  ;;  %p1476_p12 = pneg %p1475_p7  ;;  %p1482_p4 = por %p1481_p2, %p1480_p1 }
  0x92   : > { %1192 = vmatprep.subr.bf16.mxu0 %v1191_v21  ;;  %1218 = vmatpush3.bf16.msra.mxu1 %v1215_v31  ;;  %v1231_v59 = vpack.c.bf16 %v492_v55, %v491_v54  ;;  %v493_v60 = vld [vmem:[#allocation7 + $0x60] sm:$0xff]  ;;  %v645_v62 = vrot.slane %v640_v58, %v644_v57  ;;  %v656_v1 = vrot.slane %v640_v58, %v655_v63  ;;  %v495_v4 = vld [vmem:[#allocation7 + $0x70] sm:$0xff]  ;;  %v496_v5 = vld [vmem:[#allocation7 + $0x78] sm:$0xff] }
  0x93   : > { %1220 = vmatprep.subr.bf16.mxu1 %v1219_v39  ;;  %v1235_v0 = vpack.c.bf16 %v494_v61, %v493_v60  ;;  %v667_v3 = vrot.slane %v640_v58, %v666_v2  ;;  %v1239_v6 = vpack.c.bf16 %v496_v5, %v495_v4  ;;  %p1483_p9 = pnand %p1482_p4, %p1476_p12 }
  0x94   : > { %638 = vadd.xlane.f32.xlu1 %v627_v35  ;;  %636 = vadd.xlane.f32.xlu0 %v626_v38 }
  0x95   : > { %1194 = vmatpush3.bf16.msra.mxu0 %v1191_v21 }
  0x96   : > { %1196 = vmatprep.subr.bf16.mxu0 %v1195_v34  ;;  %1222 = vmatpush3.bf16.msra.mxu1 %v1219_v39 }
  0x97   : > { %1224 = vmatprep.subr.bf16.mxu1 %v1223_v46 }
  0x99   : > { %1198 = vmatpush3.bf16.msra.mxu0 %v1195_v34 }
  0x9a   : > { %1200 = vmatprep.subr.bf16.mxu0 %v1199_v42  ;;  %1226 = vmatpush3.bf16.msra.mxu1 %v1223_v46 }
  0x9b   : > { %1228 = vmatprep.subr.bf16.mxu1 %v1227_v53 }
  0x9d   : > { %1202 = vmatpush3.bf16.msra.mxu0 %v1199_v42 }
  0x9e   : > { %1204 = vmatprep.subr.bf16.mxu0 %v1203_v49  ;;  %1230 = vmatpush3.bf16.msra.mxu1 %v1227_v53 }
  0x9f   : > { %1232 = vmatprep.subr.bf16.mxu1 %v1231_v59 }
  0xa1   : > { %1206 = vmatpush3.bf16.msra.mxu0 %v1203_v49 }
  0xa2   : > { %1208 = vmatprep.subr.bf16.mxu0 %v1207_v56  ;;  %1234 = vmatpush3.bf16.msra.mxu1 %v1231_v59 }
  0xa3   : > { %1236 = vmatprep.subr.bf16.mxu1 %v1235_v0 }
  0xa5   : > { %1210 = vmatpush3.bf16.msra.mxu0 %v1207_v56  ;;  %651 = vbcast.lane.b32.xlu1 %v645_v62, 264 }
  0xa6   : > { %1238 = vmatpush3.bf16.msra.mxu1 %v1235_v0 }
  0xa7   : > { %1240 = vmatprep.subr.bf16.mxu1 %v1239_v6 }
  0xa8   : > { %1142 = vmatmul.mubr.f32.vlgmr.msra.gmra.mrb[0].mxu0 %v1827_v18 }
  0xa9   : > { %658 = vbcast.lane.b32.xlu1 %v656_v1, 256 }
  0xaa   : > { %647 = vbcast.lane.b32.xlu0 %v645_v62, 256  ;;  %1242 = vmatpush3.bf16.msra.mxu1 %v1239_v6 }
  0xad   : > { %662 = vbcast.lane.b32.xlu1 %v656_v1, 264 }
  0xae   : > { %669 = vbcast.lane.b32.xlu0 %v667_v3, 256 }
  0xb1   : > { %673 = vbcast.lane.b32.xlu1 %v667_v3, 264 }
 0x119   : > { %v633_v8 = vpop.xlane.xlu1 %632  ;;  %v629_v9 = vpop.xlane.xlu0 %628 }
 0x11d   : > { %v635_v10 = vpop.xlane.xlu1 %634  ;;  %v631_v11 = vpop.xlane.xlu0 %630 }
 0x121   : > { %v639_v12 = vpop.xlane.xlu1 %638  ;;  %v637_v13 = vpop.xlane.xlu0 %636 }
 0x125   : > { %v652_v14 = vpop.permute.xlu1 %651  ;;  %v648_v16 = vpop.permute.xlu0 %647 }
 0x126   : > { %v1842_v15 = vadd.f32 %v652_v14, %v631_v11  ;;  %v1844_v17 = vadd.f32 %v648_v16, %v629_v9 }
 0x128   : > { %v697_v18 = vand.u32 2147483647, %v1842_v15  ;;  %854 = vperm.xlu0 %1326, %v1842_v15   ;;  %v696_v20 = vand.u32 2147483647, %v1844_v17  ;;  %851 = vperm.xlu1 %1325, %v1844_v17   ;;  %v691_v0 = vmax.f32 %v1842_v15, 0.0  ;;  %v690_v3 = vmax.f32 %v1844_v17, 0.0 }
 0x129   : > { %v659_v19 = vpop.permute.xlu1 %658  ;;  %v670_v23 = vpop.permute.xlu0 %669 }
 0x12a   : > { %v703_v21 = vsub.f32 0.0, %v697_v18  ;;  %v1850_v22 = vadd.f32 %v659_v19, %v633_v8  ;;  %v702_v24 = vsub.f32 0.0, %v696_v20  ;;  %v1852_v25 = vadd.f32 %v670_v23, %v637_v13 }
 0x12c   : > { %v710_v26 = vmul.f32 1.442695, %v703_v21  ;;  %v698_v27 = vand.u32 2147483647, %v1850_v22  ;;  %v708_v28 = vmul.f32 1.442695, %v702_v24  ;;  %857 = vperm.xlu1 %1325, %v1850_v22  }
 0x12d   : > { %v663_v29 = vpop.permute.xlu1 %662  ;;  %v700_v30 = vand.u32 2147483647, %v1852_v25  ;;  %v692_v16 = vmax.f32 %v1850_v22, 0.0 }
 0x12e   : > { %1327 = vpow2.f32 %v710_v26  ;;  %v704_v31 = vsub.f32 0.0, %v698_v27  ;;  %v1857_v32 = vadd.f32 %v663_v29, %v635_v10 }
 0x12f   : > { %1329 = vpow2.f32 %v708_v28  ;;  %v706_v33 = vsub.f32 0.0, %v700_v30  ;;  %v694_v30 = vmax.f32 %v1852_v25, 0.0 }
 0x130   : > { %v712_v34 = vmul.f32 1.442695, %v704_v31  ;;  %v699_v35 = vand.u32 2147483647, %v1857_v32  ;;  %860 = vperm.xlu0 %1326, %v1857_v32  }
 0x131   : > { %v674_v36 = vpop.permute.xlu1 %673  ;;  %v716_v37 = vmul.f32 1.442695, %v706_v33 }
 0x132   : > { %1331 = vpow2.f32 %v712_v34  ;;  %v705_v38 = vsub.f32 0.0, %v699_v35  ;;  %v1861_v39 = vadd.f32 %v674_v36, %v639_v12  ;;  %v693_v35 = vmax.f32 %v1857_v32, 0.0 }
 0x133   : > { %1333 = vpow2.f32 %v716_v37 }
 0x134   : > { %v714_v40 = vmul.f32 1.442695, %v705_v38  ;;  %v701_v41 = vand.u32 2147483647, %v1861_v39 }
 0x136   : > { %1335 = vpow2.f32 %v714_v40  ;;  %v707_v42 = vsub.f32 0.0, %v701_v41 }
 0x138   : > { %v1328_v43 = vpop.eup %1327  ;;  %v718_v44 = vmul.f32 1.442695, %v707_v42 }
 0x139   : > { %v1330_v46 = vpop.eup %1329  ;;  %v729_v47 = vadd.f32 1.0, %v1328_v43  ;;  %v732_v50 = vmul.f32 -0.5, %v1328_v43  ;;  %v735_v59 = vand.u32 2147483647, %v1328_v43 }
 0x13a   : > { %1337 = vpow2.f32 %v718_v44  ;;  %v720_v48 = vadd.f32 1.0, %v1330_v46  ;;  %v723_v53 = vmul.f32 -0.5, %v1330_v46  ;;  %v726_v63 = vand.u32 2147483647, %v1330_v46 }
 0x13b   : > { %1339 = vlog2.f32 %v729_v47  ;;  %v733_v57 = vadd.f32 1.0, %v732_v50  ;;  %vm1866_vm0 = vcmp.lt.f32.partialorder %v735_v59, 0.0004427343 }
 0x13c   : > { %v1332_v49 = vpop.eup %1331  ;;  %1341 = vlog2.f32 %v720_v48  ;;  %v724_v60 = vadd.f32 1.0, %v723_v53  ;;  %vm1870_vm1 = vcmp.lt.f32.partialorder %v726_v63, 0.0004427343 }
 0x13d   : > { %v1334_v51 = vpop.eup %1333  ;;  %v738_v54 = vadd.f32 1.0, %v1332_v49  ;;  %v741_v58 = vmul.f32 -0.5, %v1332_v49  ;;  %v744_v1 = vand.u32 2147483647, %v1332_v49  ;;  %v734_v4 = vmul.f32 %v1328_v43, %v733_v57 }
 0x13e   : > { %v756_v55 = vadd.f32 1.0, %v1334_v51  ;;  %v759_v62 = vmul.f32 -0.5, %v1334_v51  ;;  %v725_v9 = vmul.f32 %v1330_v46, %v724_v60  ;;  %v762_v15 = vand.u32 2147483647, %v1334_v51 }
 0x13f   : > { %1343 = vlog2.f32 %v738_v54  ;;  %v742_v5 = vadd.f32 1.0, %v741_v58  ;;  %vm1875_vm2 = vcmp.lt.f32.partialorder %v744_v1, 0.0004427343  ;;  %v695_v54 = vmax.f32 %v1861_v39, 0.0 }
 0x140   : > { %v1336_v56 = vpop.eup %1335  ;;  %1345 = vlog2.f32 %v756_v55  ;;  %v760_v11 = vadd.f32 1.0, %v759_v62  ;;  %vm1884_vm3 = vcmp.lt.f32.partialorder %v762_v15, 0.0004427343  ;;  %v1064_v62 = vld [vmem:[%s1976_s2] ss:$0 sm:$0xff] }
 0x141   : > { %v747_v61 = vadd.f32 1.0, %v1336_v56  ;;  %v750_v6 = vmul.f32 -0.5, %v1336_v56  ;;  %v743_v20 = vmul.f32 %v1332_v49, %v742_v5  ;;  %v753_v28 = vand.u32 2147483647, %v1336_v56 }
 0x142   : > { %v761_v29 = vmul.f32 %v1334_v51, %v760_v11 }
 0x143   : > { %1347 = vlog2.f32 %v747_v61  ;;  %v751_v21 = vadd.f32 1.0, %v750_v6  ;;  %vm754_vm4 = vcmp.lt.f32.partialorder %v753_v28, 0.0004427343 }
 0x144   : > { %v1338_v2 = vpop.eup %1337 }
 0x145   : > { %v1340_v7 = vpop.eup %1339  ;;  %v765_v10 = vadd.f32 1.0, %v1338_v2  ;;  %v768_v23 = vmul.f32 -0.5, %v1338_v2  ;;  %v752_v41 = vmul.f32 %v1336_v56, %v751_v21  ;;  %v771_v46 = vand.u32 2147483647, %v1338_v2 }
 0x146   : > { %v1342_v12 = vpop.eup %1341  ;;  %v731_v13 = vmul.f32 0.6931472, %v1340_v7 }
 0x147   : > { %v722_v17 = vmul.f32 0.6931472, %v1342_v12  ;;  %1349 = vlog2.f32 %v765_v10  ;;  %v769_v42 = vadd.f32 1.0, %v768_v23  ;;  %vm772_vm5 = vcmp.lt.f32.partialorder %v771_v46, 0.0004427343 }
 0x148   : > { %v737_v19 = vsel %vm1866_vm0, %v734_v4, %v731_v13 }
 0x149   : > { %v1344_v24 = vpop.eup %1343  ;;  %v775_v26 = vadd.f32 %v737_v19, %v691_v0  ;;  %v728_v27 = vsel %vm1870_vm1, %v725_v9, %v722_v17  ;;  %v770_v51 = vmul.f32 %v1338_v2, %v769_v42 }
 0x14a   : > { %v1346_v22 = vpop.eup %1345  ;;  %v774_v31 = vadd.f32 %v728_v27, %v690_v3  ;;  %v740_v33 = vmul.f32 0.6931472, %v1344_v24 }
 0x14b   : > { %v781_v36 = vadd.f32 1e-06, %v775_v26  ;;  %v758_v37 = vmul.f32 0.6931472, %v1346_v22 }
 0x14c   : > { %v780_v38 = vadd.f32 1e-06, %v774_v31  ;;  %v746_v40 = vsel %vm1875_vm2, %v743_v20, %v740_v33 }
 0x14d   : > { %v1348_v43 = vpop.eup %1347  ;;  %796 = vperm.xlu1 %1325, %v781_v36   ;;  %v776_v44 = vadd.f32 %v746_v40, %v692_v16  ;;  %v764_v47 = vsel %vm1884_vm3, %v761_v29, %v758_v37 }
 0x14e   : > { %793 = vperm.xlu0 %1326, %v780_v38   ;;  %v749_v48 = vmul.f32 0.6931472, %v1348_v43  ;;  %v778_v49 = vadd.f32 %v764_v47, %v694_v30 }
 0x14f   : > { %v782_v32 = vadd.f32 1e-06, %v776_v44  ;;  %v1065_v44 = vld [vmem:[%s1978_s4] ss:$0 sm:$0xff] }
 0x150   : > { %v755_v50 = vsel %vm754_vm4, %v752_v41, %v749_v48  ;;  %v784_v56 = vadd.f32 1e-06, %v778_v49 }
 0x151   : > { %v1350_v53 = vpop.eup %1349  ;;  %799 = vperm.xlu1 %1325, %v782_v32   ;;  %v777_v55 = vadd.f32 %v755_v50, %v693_v35 }
 0x152   : > { %v767_v57 = vmul.f32 0.6931472, %v1350_v53 }
 0x153   : > { %v783_v58 = vadd.f32 1e-06, %v777_v55 }
 0x154   : > { %v773_v59 = vsel %vm772_vm5, %v770_v51, %v767_v57 }
 0x155   : > { %802 = vperm.xlu0 %1326, %v783_v58   ;;  %v779_v60 = vadd.f32 %v773_v59, %v695_v54  ;;  %805 = vperm.xlu1 %1325, %v784_v56  }
 0x157   : > { %v785_v61 = vadd.f32 1e-06, %v779_v60 }
 0x159   : > { %808 = vperm.xlu0 %1326, %v785_v61   ;;  %863 = vperm.xlu1 %1325, %v1852_v25   ;;  %v1900_v25 = vand.u32 127, %v579_v45 }
 0x15b   : > { %v814_v8 = vadd.s32 4294967288, %v1900_v25  ;;  %v812_v11 = vsub.s32 %v1900_v25, %v1833_v52  ;;  %vm581_vm12 = vcmp.ge.s32.totalorder %v1900_v25, 64 }
 0x15d   : > { %866 = vperm.xlu0 %1326, %v1861_v39   ;;  %v817_v12 = vsub.s32 %v814_v8, %v1833_v52 }
 0x17b   : > { %v1143_v63 = vpop.f32.mrb[0].mxu0 }
 0x17c   : > { %v476_v0 = vadd.f32 %v1143_v63, %v1064_v62  ;;  %v470_v1 = vpop.f32.mrb[1].mxu0 }
 0x17d   : > { %v471_v2 = vadd.f32 %v1064_v62, %v470_v1 }
 0x17e   : > { %v480_v4 = vmax.f32 %v476_v0, 0.0 }
 0x17f   : > { %v479_v3 = vmax.f32 %v471_v2, 0.0 }
 0x181   : > { %1176 = vmatprep.mubr.f32.mxu1 %v479_v3 }
 0x182   : > { %1177 = vmatmul.mubr.f32.vlgmr.msra.gmra.mrb[0].mxu1 %v480_v4 }
 0x1a7   : > { %v852_v5 = vpop.permute.xlu1 %851  ;;  %v855_v6 = vpop.permute.xlu0 %854 }
 0x1a8   : > { %v871_v19 = vrot.slane %v852_v5, %v812_v11  ;;  %v875_v20 = vrot.slane %v855_v6, %v817_v12 }
 0x1aa   : > { %v876_v30 = vsel %vm819_vm6, %v875_v20, %v871_v19 }
 0x1ab   : > { %v858_v7 = vpop.permute.xlu1 %857 }
 0x1ac   : > { %v880_v21 = vrot.slane %v858_v7, %v812_v11 }
 0x1af   : > { %v861_v39 = vpop.permute.xlu0 %860 }
 0x1b0   : > { %v884_v23 = vrot.slane %v861_v39, %v817_v12 }
 0x1b2   : > { %v885_v31 = vsel %vm819_vm6, %v884_v23, %v880_v21 }
 0x1b3   : > { %v895_v37 = vsel %vm839_vm7, %v885_v31, %v876_v30 }
 0x1cc   : > { %v797_v9 = vpop.permute.xlu1 %796 }
 0x1cd   : > { %v794_v10 = vpop.permute.xlu0 %793  ;;  %v818_v14 = vrot.slane %v797_v9, %v817_v12 }
 0x1ce   : > { %v813_v15 = vrot.slane %v794_v10, %v812_v11 }
 0x1d0   : > { %v800_v13 = vpop.permute.xlu1 %799  ;;  %v820_v26 = vsel %vm819_vm6, %v818_v14, %v813_v15 }
 0x1d1   : > { %v824_v16 = vrot.slane %v800_v13, %v812_v11 }
 0x1d4   : > { %v803_v17 = vpop.permute.xlu0 %802  ;;  %v806_v18 = vpop.permute.xlu1 %805 }
 0x1d5   : > { %v828_v45 = vrot.slane %v803_v17, %v817_v12  ;;  %v833_v24 = vrot.slane %v806_v18, %v812_v11 }
 0x1d7   : > { %v829_v27 = vsel %vm819_vm6, %v828_v45, %v824_v16 }
 0x1d8   : > { %v809_v28 = vpop.permute.xlu0 %808  ;;  %v864_v29 = vpop.permute.xlu1 %863  ;;  %v840_v33 = vsel %vm839_vm7, %v829_v27, %v820_v26 }
 0x1d9   : > { %v837_v22 = vrot.slane %v809_v28, %v817_v12  ;;  %v889_v35 = vrot.slane %v864_v29, %v812_v11 }
 0x1db   : > { %v838_v34 = vsel %vm819_vm6, %v837_v22, %v833_v24 }
 0x1dc   : > { %v867_v36 = vpop.permute.xlu0 %866  ;;  %v842_v40 = vsel %vm841_vm8, %v838_v34, %v840_v33 }
 0x1dd   : > { %v893_v38 = vrot.slane %v867_v36, %v817_v12 }
 0x1df   : > { %v894_v41 = vsel %vm819_vm6, %v893_v38, %v889_v35 }
 0x1e0   : > { %v896_v42 = vsel %vm841_vm8, %v894_v41, %v895_v37 }
 0x1e1   : > { %v898_v43 = vsel %vm689_vm9, %v842_v40, %v896_v42 }
 0x1e2   : > { %900 = vst.msk [vmem:[%s378_s25] sm:$0x7] %vm899_vm10, %v898_v43 }
 0x255   : > { %v1178_v46 = vpop.f32.mrb[0].mxu1 }
 0x256   : > { %v576_v47 = vadd.f32 %v1178_v46, %v1065_v44  ;;  %v570_v48 = vpop.f32.mrb[1].mxu1 }
 0x257   : > { %v571_v49 = vadd.f32 %v1065_v44, %v570_v48 }
 0x258   : > { %v585_v32 = vand.u32 2147483647, %v576_v47  ;;  %v583_v5 = vmax.f32 %v576_v47, 0.0 }
 0x259   : > { %v584_v52 = vand.u32 2147483647, %v571_v49  ;;  %v582_v8 = vmax.f32 %v571_v49, 0.0 }
 0x25a   : > { %v587_v50 = vsub.f32 0.0, %v585_v32 }
 0x25b   : > { %v586_v51 = vsub.f32 0.0, %v584_v52 }
 0x25c   : > { %v590_v53 = vmul.f32 1.442695, %v587_v50 }
 0x25d   : > { %v588_v54 = vmul.f32 1.442695, %v586_v51 }
 0x25e   : > { %1351 = vpow2.f32 %v590_v53 }
 0x25f   : > { %1353 = vpow2.f32 %v588_v54 }
 0x268   : > { %v1352_v55 = vpop.eup %1351 }
 0x269   : > { %v1354_v56 = vpop.eup %1353  ;;  %v601_v57 = vadd.f32 1.0, %v1352_v55  ;;  %v604_v59 = vmul.f32 -0.5, %v1352_v55  ;;  %v607_v62 = vand.u32 2147483647, %v1352_v55 }
 0x26a   : > { %v592_v58 = vadd.f32 1.0, %v1354_v56  ;;  %v595_v60 = vmul.f32 -0.5, %v1354_v56  ;;  %v598_v0 = vand.u32 2147483647, %v1354_v56 }
 0x26b   : > { %1355 = vlog2.f32 %v601_v57  ;;  %v605_v61 = vadd.f32 1.0, %v604_v59  ;;  %vm608_vm11 = vcmp.lt.f32.partialorder %v607_v62, 0.0004427343 }
 0x26c   : > { %1357 = vlog2.f32 %v592_v58  ;;  %v596_v63 = vadd.f32 1.0, %v595_v60  ;;  %vm599_vm13 = vcmp.lt.f32.partialorder %v598_v0, 0.0004427343 }
 0x26d   : > { %v606_v4 = vmul.f32 %v1352_v55, %v605_v61 }
 0x26e   : > { %v597_v7 = vmul.f32 %v1354_v56, %v596_v63 }
 0x275   : > { %v1356_v1 = vpop.eup %1355 }
 0x276   : > { %v1358_v2 = vpop.eup %1357  ;;  %v603_v3 = vmul.f32 0.6931472, %v1356_v1 }
 0x277   : > { %v594_v6 = vmul.f32 0.6931472, %v1358_v2 }
 0x278   : > { %v609_v39 = vsel %vm608_vm11, %v606_v4, %v603_v3 }
 0x279   : > { %v611_v9 = vadd.f32 %v609_v39, %v583_v5  ;;  %v600_v10 = vsel %vm599_vm13, %v597_v7, %v594_v6 }
 0x27a   : > { %v610_v11 = vadd.f32 %v600_v10, %v582_v8 }
 0x27b   : > { %v613_v12 = vsel %vm581_vm12, %v611_v9, %v576_v47 }
 0x27c   : > { %615 = vst [vmem:[%s368_s15 + $0x8] sm:$0xff] %v613_v12  ;;  %v612_v25 = vsel %vm581_vm12, %v610_v11, %v571_v49 }
 0x27d   : > { %614 = vst [vmem:[%s368_s15] sm:$0xff] %v612_v25 }
 0x27e   : > { %1486 = shalt.err (!%p1483_p9)
}
 0x27f   : > { %s1487_s24 = scalar_lea.hbm %s1930_s19, 256  ;;  %s1491_s14 = scalar_lea.hbm %s1981_s7, 512 }
 0x280   : > { %p1488_p0 = scmp.ne.s32.totalorder %s1930_s19, %s1487_s24  ;;  %p1492_p13 = scmp.lt.u32.totalorder %s1930_s19, %s1981_s7 }
 0x281   : > { %p1493_p6 = scmp.lt.u32.totalorder %s1491_s14, %s1487_s24  ;;  %p1495_p3 = scmp.lt.u32.totalorder %s1487_s24, %s1930_s19 }
 0x282   : > { %p1489_p11 = pnand %p1488_p0, %p1758_p5 }
 0x283   : > { %p1494_p10 = por %p1493_p6, %p1492_p13 }
 0x284   : > { %p1490_p8 = pneg %p1489_p11 }
 0x285   : > { %p1496_p7 = por %p1495_p3, %p1494_p10 }
 0x287   : > { %p1497_p12 = pnand %p1496_p7, %p1490_p8 }
 0x289   : > { %1500 = shalt.err (!%p1497_p12)
}
 0x28a   : > { %s1557_s10 = smov 128   ;;  %s1558_s13 = smov 8  }
 0x28b   : > { %1257 = dma.vmem_to_hbm [thread:$0]  (%p1758_p5), %s1925_s27, 256, %s1930_s19, %s902_s9, %s1557_s10, %s1557_s10, %s1558_s13  }
 0x28c PF: > { %s2012_s21 = sld [smem:[#allocation15_spill]]  ;;  %s2013_s17 = sld [smem:[#allocation16_spill]] }
 0x28d   : > { %p2015_p2 = scmp.ge.s32.totalorder %s1547_s30, 2 }
 0x292   : > { %s937_s18 = sand.u32 1, %s2012_s21   ;;  %p2014_p1 = scmp.ne.s32.totalorder %s2013_s17, 0 }
 0x293   : > { %s938_s16 = scalar_lea.sflag [#allocation4], %s937_s18 }
 0x294   : > { %p1274_p4 = pnand %p2015_p2, %p2014_p1 }
 0x296   : > { %1530 = dma.done.wait (!%p1274_p4), %s938_s16, 256  }
 0x297   : > { %1532 = vsyncadd (!%p1274_p4), %s938_s16, 4294967040  ;;  %p24_p9 = scmp.ge.s32.totalorder %s1744_s26, 4   ;;  %s2016_s27 = smov %s1539_s28 }
 0x298   : > { %s2017_s28 = smov %s1543_s29  ;;  %s2018_s29 = smov %s1754_s22 }
 0x299   : > { %s2019_s30 = smov %s1744_s26  ;;  %26 = sbr.rel (!%p24_p9) target bundleno = 7 (0x7), region = 117 }
 0x2a0   :  { %950 = vsyncpa [#allocation3], 1 }
 0x2a1   :  { %952 = vsyncpa [#allocation3 + $0x1], 1 }
 0x2a2   :  { %953 = vsyncpa [#allocation6], 1 }
 0x2a3   :  { %954 = vsyncpa [#allocation9], 1 }
 0x2a4   :  { %955 = vsyncpa [#allocation4], 1 }
 0x2a5   :  { %957 = vsyncpa [#allocation4 + $0x1], 1 }

</bundles_post_ra>
